<compile_context>
chip_gen: v5e
topology: v5e:2x2
jax: 0.10.0
libtpu: 0.0.40
codegen_flags: <defaults>
</compile_context>

<pallas_src>
import functools

import jax
import jax.numpy as jnp
from jax.experimental import pallas as pl
from jax.experimental.pallas import tpu as pltpu


def _round_up(x: int, m: int) -> int:
    return ((x + m - 1) // m) * m


def _pad2(a, rows: int, cols: int):
    r, c = a.shape
    return jnp.pad(a, ((0, rows - r), (0, cols - c)))


def _mlp_kernel(x_ref, w1_ref, b1_ref, w2_ref, b2_ref, w3_ref, b3_ref, o_ref,
                *, tanh: bool):
    # Layer 1: Linear + ReLU  (bf16 matmul, f32 accumulate / elementwise)
    h1 = jnp.dot(x_ref[...], w1_ref[...], preferred_element_type=jnp.float32)
    h1 = jnp.maximum(h1 + b1_ref[...], 0.0)
    # Layer 2: Linear + ReLU
    h2 = jnp.dot(h1.astype(jnp.bfloat16), w2_ref[...],
                 preferred_element_type=jnp.float32)
    h2 = jnp.maximum(h2 + b2_ref[...], 0.0)
    # Layer 3: Linear [+ Tanh]
    out = jnp.dot(h2.astype(jnp.bfloat16), w3_ref[...],
                  preferred_element_type=jnp.float32)
    out = out + b3_ref[...]
    if tanh:
        out = jnp.tanh(out)
    o_ref[...] = out.astype(o_ref.dtype)


def td3_component_forward(x, params, *, tanh: bool, batch_tile: int | None = None):
    """Fused TD3Component MLP forward pass.

    x:      [B, in_size] float32
    params: dict with w1 [in,300], b1 [1,300], w2 [300,400], b2 [1,400],
            w3 [400,out], b3 [1,out] (all float32)
    """
    w1, b1 = params["w1"], params["b1"]
    w2, b2 = params["w2"], params["b2"]
    w3, b3 = params["w3"], params["b3"]

    B, in_size = x.shape
    h1_size, h2_size = w1.shape[1], w2.shape[1]
    out_size = w3.shape[1]

    # Lane-aligned padded feature dims (multiples of 128).
    in_p = _round_up(in_size, 128)
    h1_p = _round_up(h1_size, 128)     # 300 -> 384
    h2_p = _round_up(h2_size, 128)     # 400 -> 512
    out_p = _round_up(out_size, 128)   # 6 / 1 -> 128

    # Batch tile: MXU-sized, but keep >= 2 grid steps when the batch allows so
    # v7x can shard the parallel batch axis across both TensorCores.
    if batch_tile is None:
        half = _round_up(max(pl.cdiv(B, 2), 1), 8)
        batch_tile = max(8, min(256, half))
    batch_tile = _round_up(batch_tile, 8)
    B_pad = _round_up(B, batch_tile)
    grid = (B_pad // batch_tile,)

    # Pad + cast once in the wrapper (weights/x -> bf16, biases stay f32).
    xp = _pad2(x, B_pad, in_p).astype(jnp.bfloat16)
    w1p = _pad2(w1, in_p, h1_p).astype(jnp.bfloat16)
    w2p = _pad2(w2, h1_p, h2_p).astype(jnp.bfloat16)
    w3p = _pad2(w3, h2_p, out_p).astype(jnp.bfloat16)
    b1p = _pad2(b1, 1, h1_p).astype(jnp.float32)
    b2p = _pad2(b2, 1, h2_p).astype(jnp.float32)
    b3p = _pad2(b3, 1, out_p).astype(jnp.float32)

    kernel = functools.partial(_mlp_kernel, tanh=tanh)

    flops = 2 * B_pad * (in_p * h1_p + h1_p * h2_p + h2_p * out_p)
    transcendentals = B_pad * out_p if tanh else 0
    bytes_accessed = (
        xp.size * 2 + w1p.size * 2 + w2p.size * 2 + w3p.size * 2
        + b1p.size * 4 + b2p.size * 4 + b3p.size * 4 + B_pad * out_p * 4)
    cost = pl.CostEstimate(flops=flops, transcendentals=transcendentals,
                           bytes_accessed=bytes_accessed)

    resident = lambda shape: pl.BlockSpec(shape, lambda i: (0, 0))

    out_full = pl.pallas_call(
        kernel,
        out_shape=jax.ShapeDtypeStruct((B_pad, out_p), jnp.float32),
        grid_spec=pltpu.PrefetchScalarGridSpec(
            num_scalar_prefetch=0,
            grid=grid,
            in_specs=[
                pl.BlockSpec((batch_tile, in_p), lambda i: (i, 0)),  # x
                resident((in_p, h1_p)), resident((1, h1_p)),         # w1, b1
                resident((h1_p, h2_p)), resident((1, h2_p)),         # w2, b2
                resident((h2_p, out_p)), resident((1, out_p)),       # w3, b3
            ],
            out_specs=pl.BlockSpec((batch_tile, out_p), lambda i: (i, 0)),
        ),
        compiler_params=pltpu.CompilerParams(
            dimension_semantics=("parallel",)),
        cost_estimate=cost,
    )(xp, w1p, b1p, w2p, b2p, w3p, b3p)

    return out_full[:B, :out_size]


def init_params(key, in_size, out_size):
    """Deterministic init mimicking nn.Linear default (U(-1/sqrt(fan_in), +))."""
    dims = [(in_size, 300), (300, 400), (400, out_size)]
    params = {}
    for idx, (fi, fo) in enumerate(dims, start=1):
        key, kw, kb = jax.random.split(key, 3)
        bound = 1.0 / jnp.sqrt(jnp.float32(fi))
        params[f"w{idx}"] = jax.random.uniform(
            kw, (fi, fo), jnp.float32, minval=-bound, maxval=bound)
        params[f"b{idx}"] = jax.random.uniform(
            kb, (1, fo), jnp.float32, minval=-bound, maxval=bound)
    return params


def reference_forward_bf16(x, params, tanh):
    """Pure-JAX reference mirroring the kernel's bf16-matmul / f32-accumulate."""
    bf = jnp.bfloat16
    h1 = jnp.dot(x.astype(bf), params["w1"].astype(bf),
                 preferred_element_type=jnp.float32) + params["b1"]
    h1 = jnp.maximum(h1, 0.0)
    h2 = jnp.dot(h1.astype(bf), params["w2"].astype(bf),
                 preferred_element_type=jnp.float32) + params["b2"]
    h2 = jnp.maximum(h2, 0.0)
    out = jnp.dot(h2.astype(bf), params["w3"].astype(bf),
                  preferred_element_type=jnp.float32) + params["b3"]
    return jnp.tanh(out) if tanh else out


def reference_forward_f32(x, params, tanh):
    h1 = jnp.maximum(x @ params["w1"] + params["b1"], 0.0)
    h2 = jnp.maximum(h1 @ params["w2"] + params["b2"], 0.0)
    out = h2 @ params["w3"] + params["b3"]
    return jnp.tanh(out) if tanh else out


if __name__ == "__main__":
    # HalfCheetah-style shapes: obs dim 17, action dim 6 (actor uses tanh).
    # Small batch (32) still exercises padding and a 2-step (v7x-friendly) grid.
    batch, in_size, out_size, tanh = 32, 17, 6, True

    key = jax.random.PRNGKey(0)
    key, kx = jax.random.split(key)
    x = jax.random.normal(kx, (batch, in_size), jnp.float32)
    params = init_params(key, in_size, out_size)

    out = td3_component_forward(x, params, tanh=tanh)
    out = jax.block_until_ready(out)
    assert out.shape == (batch, out_size)

    ref_bf16 = reference_forward_bf16(x, params, tanh)
    assert jnp.allclose(out, ref_bf16, atol=2e-3, rtol=2e-3), \
        "mismatch vs bf16-matmul reference"

    ref_f32 = reference_forward_f32(x, params, tanh)
    assert jnp.allclose(out, ref_f32, atol=1e-1, rtol=1e-1), \
        "mismatch vs f32 reference (sanity)"

    print("KERNEL_OK")
</pallas_src>

<mosaic_0001>
module attributes {stable_mosaic.version = 11 : i64} {
  func.func @_mlp_kernel(%arg0: i32, %arg1: memref<16x128xbf16, #tpu.memory_space<vmem>>, %arg2: memref<128x384xbf16, #tpu.memory_space<vmem>>, %arg3: memref<1x384xf32, #tpu.memory_space<vmem>>, %arg4: memref<384x512xbf16, #tpu.memory_space<vmem>>, %arg5: memref<1x512xf32, #tpu.memory_space<vmem>>, %arg6: memref<512x128xbf16, #tpu.memory_space<vmem>>, %arg7: memref<1x128xf32, #tpu.memory_space<vmem>>, %arg8: memref<16x128xf32, #tpu.memory_space<vmem>>) attributes {dimension_semantics = [#tpu.dimension_semantics<parallel>], iteration_bounds = array<i64: 2>, scalar_prefetch = 0 : i64, scratch_operands = 0 : i64, tpu.core_type = #tpu.core_type<tc>, window_params = [{transform_indices = @transform_0, window_bounds = array<i64: 16, 128>}, {pipeline_mode = #tpu.pipeline_mode<synchronous>, transform_indices = @transform_1, window_bounds = array<i64: 128, 384>}, {pipeline_mode = #tpu.pipeline_mode<synchronous>, transform_indices = @transform_2, window_bounds = array<i64: 1, 384>}, {pipeline_mode = #tpu.pipeline_mode<synchronous>, transform_indices = @transform_3, window_bounds = array<i64: 384, 512>}, {pipeline_mode = #tpu.pipeline_mode<synchronous>, transform_indices = @transform_4, window_bounds = array<i64: 1, 512>}, {pipeline_mode = #tpu.pipeline_mode<synchronous>, transform_indices = @transform_5, window_bounds = array<i64: 512, 128>}, {pipeline_mode = #tpu.pipeline_mode<synchronous>, transform_indices = @transform_6, window_bounds = array<i64: 1, 128>}, {transform_indices = @transform_7, window_bounds = array<i64: 16, 128>}]} {
    %c0 = arith.constant 0 : index
    %c0_0 = arith.constant 0 : index
    %0 = vector.load %arg1[%c0, %c0_0] : memref<16x128xbf16, #tpu.memory_space<vmem>>, vector<16x128xbf16>
    %c0_1 = arith.constant 0 : index
    %c0_2 = arith.constant 0 : index
    %1 = vector.load %arg2[%c0_1, %c0_2] : memref<128x384xbf16, #tpu.memory_space<vmem>>, vector<128x384xbf16>
    %cst = arith.constant dense<0.000000e+00> : vector<16x384xf32>
    %2 = tpu.matmul %0, %1, %cst {dimension_numbers = #tpu.dot_dimension_numbers<[1], [0], [0], [1], [0, 0, 1, 1], [], []>} : vector<16x128xbf16>, vector<128x384xbf16>, vector<16x384xf32> -> vector<16x384xf32>
    %c0_3 = arith.constant 0 : index
    %c0_4 = arith.constant 0 : index
    %3 = vector.load %arg3[%c0_3, %c0_4] : memref<1x384xf32, #tpu.memory_space<vmem>>, vector<1x384xf32>
    %4 = vector.broadcast %3 : vector<1x384xf32> to vector<16x384xf32>
    %5 = arith.addf %2, %4 : vector<16x384xf32>
    %cst_5 = arith.constant 0.000000e+00 : f32
    %6 = vector.broadcast %cst_5 : f32 to vector<16x384xf32>
    %7 = arith.maximumf %5, %6 : vector<16x384xf32>
    %8 = arith.truncf %7 : vector<16x384xf32> to vector<16x384xbf16>
    %c0_6 = arith.constant 0 : index
    %c0_7 = arith.constant 0 : index
    %9 = vector.load %arg4[%c0_6, %c0_7] : memref<384x512xbf16, #tpu.memory_space<vmem>>, vector<384x512xbf16>
    %cst_8 = arith.constant dense<0.000000e+00> : vector<16x512xf32>
    %10 = tpu.matmul %8, %9, %cst_8 {dimension_numbers = #tpu.dot_dimension_numbers<[1], [0], [0], [1], [0, 0, 1, 1], [], []>} : vector<16x384xbf16>, vector<384x512xbf16>, vector<16x512xf32> -> vector<16x512xf32>
    %c0_9 = arith.constant 0 : index
    %c0_10 = arith.constant 0 : index
    %11 = vector.load %arg5[%c0_9, %c0_10] : memref<1x512xf32, #tpu.memory_space<vmem>>, vector<1x512xf32>
    %12 = vector.broadcast %11 : vector<1x512xf32> to vector<16x512xf32>
    %13 = arith.addf %10, %12 : vector<16x512xf32>
    %cst_11 = arith.constant 0.000000e+00 : f32
    %14 = vector.broadcast %cst_11 : f32 to vector<16x512xf32>
    %15 = arith.maximumf %13, %14 : vector<16x512xf32>
    %16 = arith.truncf %15 : vector<16x512xf32> to vector<16x512xbf16>
    %c0_12 = arith.constant 0 : index
    %c0_13 = arith.constant 0 : index
    %17 = vector.load %arg6[%c0_12, %c0_13] : memref<512x128xbf16, #tpu.memory_space<vmem>>, vector<512x128xbf16>
    %cst_14 = arith.constant dense<0.000000e+00> : vector<16x128xf32>
    %18 = tpu.matmul %16, %17, %cst_14 {dimension_numbers = #tpu.dot_dimension_numbers<[1], [0], [0], [1], [0, 0, 1, 1], [], []>} : vector<16x512xbf16>, vector<512x128xbf16>, vector<16x128xf32> -> vector<16x128xf32>
    %c0_15 = arith.constant 0 : index
    %c0_16 = arith.constant 0 : index
    %19 = vector.load %arg7[%c0_15, %c0_16] : memref<1x128xf32, #tpu.memory_space<vmem>>, vector<1x128xf32>
    %20 = vector.broadcast %19 : vector<1x128xf32> to vector<16x128xf32>
    %21 = arith.addf %18, %20 : vector<16x128xf32>
    %22 = math.tanh %21 : vector<16x128xf32>
    %c0_17 = arith.constant 0 : index
    %c0_18 = arith.constant 0 : index
    %23 = vector.load %arg8[%c0_17, %c0_18] : memref<16x128xf32, #tpu.memory_space<vmem>>, vector<16x128xf32>
    tpu.vector_store %arg8[%c0_17, %c0_18], %22 {strides = array<i32>} : memref<16x128xf32, #tpu.memory_space<vmem>>, vector<16x128xf32>,
    return
  }
  func.func @transform_0(%arg0: i32) -> (i32, i32) {
    %c0_i32 = arith.constant 0 : i32
    %c0_i32_0 = arith.constant 0 : i32
    return %arg0, %c0_i32 : i32, i32
  }
  func.func @transform_1(%arg0: i32) -> (i32, i32) {
    %c0_i32 = arith.constant 0 : i32
    %c0_i32_0 = arith.constant 0 : i32
    %c0_i32_1 = arith.constant 0 : i32
    return %c0_i32, %c0_i32_0 : i32, i32
  }
  func.func @transform_2(%arg0: i32) -> (i32, i32) {
    %c0_i32 = arith.constant 0 : i32
    %c0_i32_0 = arith.constant 0 : i32
    %c0_i32_1 = arith.constant 0 : i32
    return %c0_i32, %c0_i32_0 : i32, i32
  }
  func.func @transform_3(%arg0: i32) -> (i32, i32) {
    %c0_i32 = arith.constant 0 : i32
    %c0_i32_0 = arith.constant 0 : i32
    %c0_i32_1 = arith.constant 0 : i32
    return %c0_i32, %c0_i32_0 : i32, i32
  }
  func.func @transform_4(%arg0: i32) -> (i32, i32) {
    %c0_i32 = arith.constant 0 : i32
    %c0_i32_0 = arith.constant 0 : i32
    %c0_i32_1 = arith.constant 0 : i32
    return %c0_i32, %c0_i32_0 : i32, i32
  }
  func.func @transform_5(%arg0: i32) -> (i32, i32) {
    %c0_i32 = arith.constant 0 : i32
    %c0_i32_0 = arith.constant 0 : i32
    %c0_i32_1 = arith.constant 0 : i32
    return %c0_i32, %c0_i32_0 : i32, i32
  }
  func.func @transform_6(%arg0: i32) -> (i32, i32) {
    %c0_i32 = arith.constant 0 : i32
    %c0_i32_0 = arith.constant 0 : i32
    %c0_i32_1 = arith.constant 0 : i32
    return %c0_i32, %c0_i32_0 : i32, i32
  }
  func.func @transform_7(%arg0: i32) -> (i32, i32) {
    %c0_i32 = arith.constant 0 : i32
    %c0_i32_0 = arith.constant 0 : i32
    return %arg0, %c0_i32 : i32, i32
  }
}

</mosaic_0001>

<bundles_post_ra>
// kernel: tpu_custom_call.1
= control target key start
LH: loop header
LB: loop body
LE: loop exit
PB: predicated region body
PF: predicated region fallthrough
CT: control target
= control target key end

     0   :  { %s3251_s0 = inlined_call_operand.hbm [shape: bf16[32,128], index: 0, kind: input, shape index: {}]   ;;  %s3252_s1 = inlined_call_operand.hbm [shape: bf16[128,384], index: 1, kind: input, shape index: {}]   ;;  %s3253_s2 = inlined_call_operand.hbm [shape: f32[1,384], index: 2, kind: input, shape index: {}]   ;;  %s3254_s3 = inlined_call_operand.hbm [shape: bf16[384,512], index: 3, kind: input, shape index: {}]   ;;  %s3255_s4 = inlined_call_operand.hbm [shape: f32[1,512], index: 4, kind: input, shape index: {}]   ;;  %s3256_s5 = inlined_call_operand.hbm [shape: bf16[512,128], index: 5, kind: input, shape index: {}]   ;;  %s3257_s6 = inlined_call_operand.vmem [shape: f32[1,128], index: 6, kind: input, shape index: {}]   ;;  %s3258_s7 = inlined_call_operand.hbm [shape: f32[32,128], index: 7, kind: output, shape index: {}]  }
   0x1   :  { %3261 = sst [smem:[#allocation19_spill]] %s3252_s1 }
   0x2   :  { %12 = vsyncpa [#allocation3], 0 }
   0x3   :  { %14 = vsyncpa [#allocation3 + $0x1], 0 }
   0x4   :  { %15 = vsyncpa [#allocation6], 0 }
   0x5   :  { %16 = vsyncpa [#allocation9], 0 }
   0x6   :  { %17 = vsyncpa [#allocation12], 0 }
   0x7   :  { %18 = vsyncpa [#allocation4], 0 }
   0x8   :  { %20 = vsyncpa [#allocation4 + $0x1], 0  ;;  %s3044_s24 = smov 0   ;;  %s3046_s25 = smov 0  }
   0x9   :  { %s3048_s26 = smov 0   ;;  %s3050_s27 = smov 0  }
   0xa LB: > { %s3262_s1 = sld [smem:[#allocation19_spill]]  ;;  %s3068_s8 = sadd.s32 4294967295, %s2989_s27   ;;  %s2989_s27 = sphi %s3050_s27, %s3275_s27   ;;  %s2985_s26 = sphi %s3048_s26, %s3274_s26   ;;  %s2981_s25 = sphi %s3046_s25, %s3273_s25   ;;  %s2977_s24 = sphi %s3044_s24, %s3272_s24  }
   0xb   : > { %p1831_p0 = scmp.ge.s32.totalorder %s2989_s27, 1  ;;  %p47_p1 = scmp.eq.s32.totalorder %s3068_s8, 0 }
   0xc   : > { %p209_p2 = scmp.lt.s32.totalorder %s2989_s27, 3  ;;  %s2991_s10 = smov [#allocation5]  }
   0xd   : > { %s222_s11 = sshll.u32 %s2991_s10, 4  ;;  %s246_s14 = sshll.u32 %s3254_s3, 4  ;;  %s223_s11 = int_to_ptr.vmem [resolvable:$true] %s222_s11  ;;  %s247_s14 = int_to_ptr.hbm [resolvable:$true] %s246_s14 }
   0xe   : > { %p3073_p3 = pnand %p1831_p0, %p209_p2  ;;  %s2992_s16 = smov [#allocation8]  }
   0xf   : > { %s248_s17 = sshll.u32 %s2992_s16, 4  ;;  %s2993_s18 = smov 192   ;;  %s249_s17 = int_to_ptr.vmem [resolvable:$true] %s248_s17 }
  0x10   : > { %s220_s30 = sshll.u32 %s3262_s1, 4  ;;  %p2645_p4 = pneg %p3073_p3  ;;  %s221_s30 = int_to_ptr.hbm [resolvable:$true] %s220_s30 }
  0x11   : > { %s2994_s19 = smov 12   ;;  %s2995_s20 = smov 256  }
  0x12   : > { %p3085_p6 = pnand %p2645_p4, %p47_p1  ;;  %s2996_s21 = smov 16  }
  0x13   : > { %s235_s28 = sshll.u32 %s3253_s2, 4  ;;  %s2997_s29 = smov [#allocation7]   ;;  %s236_s28 = int_to_ptr.hbm [resolvable:$true] %s235_s28 }
  0x14   : > { %2648 = dma.hbm_to_vmem [thread:$0]  (!%p3085_p6), %s221_s30, 3072, %s223_s11, [#allocation6], %s2993_s18, %s2993_s18, %s2994_s19  }
  0x15   : > { %2654 = dma.hbm_to_vmem [thread:$0]  (!%p3085_p6), %s247_s14, 12288, %s249_s17, [#allocation9], %s2995_s20, %s2995_s20, %s2996_s21  }
  0x16   : > { %s237_s10 = sshll.u32 %s2997_s29, 4  ;;  %s261_s30 = sshll.u32 %s3255_s4, 4  ;;  %s238_s10 = int_to_ptr.vmem [resolvable:$true] %s237_s10  ;;  %s262_s30 = int_to_ptr.hbm [resolvable:$true] %s261_s30 }
  0x17   : > { %2651 = dma.hbm_to_vmem [thread:$0]  (!%p3085_p6), %s236_s28, 48, %s238_s10, [#allocation6]  }
  0x18   : > { %s2998_s11 = smov [#allocation10]   ;;  %s272_s18 = sshll.u32 %s3256_s5, 4  ;;  %s273_s18 = int_to_ptr.hbm [resolvable:$true] %s272_s18 }
  0x19   : > { %s263_s14 = sshll.u32 %s2998_s11, 4  ;;  %s2999_s19 = smov [#allocation11]   ;;  %s264_s14 = int_to_ptr.vmem [resolvable:$true] %s263_s14 }
  0x1a   : > { %2657 = dma.hbm_to_vmem [thread:$0]  (!%p3085_p6), %s262_s30, 64, %s264_s14, [#allocation9]  }
  0x1b   : > { %s274_s20 = sshll.u32 %s2999_s19, 4  ;;  %s3259_s21 = smov 64   ;;  %s275_s20 = int_to_ptr.vmem [resolvable:$true] %s274_s20 }
  0x1c   : > { %s3260_s22 = smov 4   ;;  %s1830_s23 = sadd.s32 4294967294, %s2989_s27  }
  0x1d   : > { %2660 = dma.hbm_to_vmem [thread:$0]  (!%p3085_p6), %s273_s18, 4096, %s275_s20, [#allocation12], %s3259_s21, %s3259_s21, %s3260_s22  }
  0x1e   : > { %s3113_s28 = sadd.s32 1, %s2989_s27   ;;  %s33_s29 = sadd.s32 1, %s2985_s26 }
  0x1f   : > { %s30_s10 = ssub.s32 %s2989_s27, %s3113_s28  ;;  %p40_p7 = scmp.ne.s32.totalorder %s2985_s26, %s2981_s25 }
  0x20   : > { %p31_p8 = scmp.eq.s32.totalorder %s30_s10, 0  ;;  %p41_p9 = scmp.eq.s32.totalorder %s2989_s27, 0 }
  0x21   : > { %p46_p10 = scmp.ne.s32.totalorder %s2981_s25, %s2977_s24  ;;  %p196_p11 = scmp.eq.s32.totalorder %s3068_s8, 1 }
  0x22   : > { %s3125_s12 = scalar_select %p31_p8, %s2985_s26, %s33_s29  }
  0x23   : > { %p3129_p12 = por %p47_p1, %p46_p10  ;;  %p3133_p13 = por %p196_p11, %p40_p7 }
  0x24   : > { %p202_p0 = scmp.eq.s32.totalorder %s1830_s23, 1  ;;  %p42_p2 = por %p41_p9, %p40_p7 }
  0x25   : > { %s291_s30 = sand.u32 1, %s2985_s26   ;;  %p2674_p6 = scmp.lt.s32.totalorder %s2989_s27, 2 }
  0x26   : > { %p3138_p4 = por %p202_p0, %p46_p10  ;;  %s1838_s14 = sshll.u32 %s291_s30, 3 }
  0x27   : > { %s2466_s16 = sshll.u32 %s2989_s27, 3  ;;  %s295_s29 = scalar_lea.vmem [#allocation2], %s1838_s14 }
  0x28   : > { %s300_s19 = scalar_lea.hbm %s3251_s0, %s2466_s16  ;;  %s303_s10 = sshll.u32 %s295_s29, 4  ;;  %s304_s10 = int_to_ptr.vmem [resolvable:$true] %s303_s10 }
  0x29   : > { %s301_s20 = sshll.u32 %s300_s19, 4  ;;  %p3147_p8 = pnand %p2674_p6, %p42_p2  ;;  %s302_s20 = int_to_ptr.hbm [resolvable:$true] %s301_s20 }
  0x2a   : > { %s292_s21 = scalar_lea.sflag [#allocation3], %s291_s30  ;;  %s2881_s22 = sshra.s32 %s302_s20, 4  ;;  %s2882_s22 = int_to_ptr.hbm [resolvable:$true] %s2881_s22 }
  0x2b   : > { %s2883_s1 = scalar_lea.hbm %s2882_s22, 8  ;;  %p2885_p9 = pneg %p3147_p8 }
  0x2c   : > { %p2884_p7 = scmp.ne.s32.totalorder %s2882_s22, %s2883_s1  ;;  %s2888_s14 = scalar_lea.hbm %s3251_s0, 16 }
  0x2d   : > { %p2889_p0 = scmp.lt.s32.totalorder %s2882_s22, %s3251_s0  ;;  %p2890_p2 = scmp.lt.s32.totalorder %s2888_s14, %s2883_s1 }
  0x2e   : > { %p2886_p10 = pnand %p2885_p9, %p2884_p7 }
  0x2f   : > { %p2891_p6 = por %p2890_p2, %p2889_p0 }
  0x30   : > { %p2887_p11 = pneg %p2886_p10 }
  0x32   : > { %p2892_p5 = pnand %p2891_p6, %p2887_p11 }
  0x34   : > { %2895 = shalt.err (!%p2892_p5)
}
  0x35   : > { %s3269_s30 = smov 4   ;;  %s3270_s29 = smov 64  }
  0x36   : > { %2664 = dma.hbm_to_vmem [thread:$0]  (!%p3147_p8), %s302_s20, 128, %s304_s10, %s292_s21, %s3270_s29, %s3270_s29, %s3269_s30  }
  0x37   : > { %315 = sbr.rel (%p3073_p3) target bundleno = 576 (0x240), region = 48  ;;  %s3167_s16 = sand.u32 (!%p3073_p3), 1, %s2981_s25  }
  0x38   : > { %s1842_s22 = sshll.u32 (!%p3073_p3), %s3167_s16, 3  ;;  %s318_s1 = scalar_lea.sflag (!%p3073_p3), [#allocation3], %s3167_s16 }
  0x39   : > { %s3171_s17 = scalar_lea.vmem (!%p3073_p3), [#allocation2], %s1842_s22 }
  0x3c   : > { %2956 = dma.done.wait (%p3129_p12), %s318_s1, 128  }
  0x3d   : > { %2958 = vsyncadd (%p3129_p12), %s318_s1, 4294967168 }
  0x3e   : > { %2960 = dma.done.wait (%p47_p1), [#allocation6], 3120  }
  0x3f   : > { %2962 = vsyncadd (%p47_p1), [#allocation6], 4294964176 }
  0x40   : > { %2964 = dma.done.wait (%p47_p1), [#allocation9], 12352  }
  0x41   : > { %2966 = vsyncadd (%p47_p1), [#allocation9], 4294954944 }
  0x42   : > { %2968 = dma.done.wait (%p47_p1), [#allocation12], 4096  }
  0x43   : > { %2970 = vsyncadd (%p47_p1), [#allocation12], 4294963200  ;;  %v1939_v0 = vld [vmem:[#allocation5 + $0xa8] sm:$0xf]  ;;  %v2490_v1 = vld [vmem:[#allocation5 + $0xb0] sm:$0xf0] }
  0x44   : > { %v2489_v2 = vld [vmem:[#allocation5 + $0xac] sm:$0xf]  ;;  %v1940_v3 = vor.u32 %v2490_v1, %v1939_v0  ;;  %v1941_v4 = vld [vmem:[#allocation5 + $0xb4] sm:$0xf0]  ;;  %v1947_v5 = vld [vmem:[#allocation5 + $0xb0] sm:$0xf] }
  0x45   : > { %v2491_v6 = vld [vmem:[#allocation5 + $0xb8] sm:$0xf0]  ;;  %v1944_v7 = vor.u32 %v2489_v2, %v1941_v4  ;;  %v1927_v9 = vld [vmem:[#allocation5 + $0x90] sm:$0xf]  ;;  %v2486_v11 = vld [vmem:[#allocation5 + $0x94] sm:$0xf] }
  0x46   : > { %v1948_v8 = vor.u32 %v2491_v6, %v1947_v5  ;;  %v2487_v10 = vld [vmem:[#allocation5 + $0x98] sm:$0xf0]  ;;  %556 = vmatpush.bf16.msra.mxu0 %v1940_v3  ;;  %v1929_v13 = vld [vmem:[#allocation5 + $0x9c] sm:$0xf0]  ;;  %v1935_v14 = vld [vmem:[#allocation5 + $0x98] sm:$0xf] }
  0x47   : > { %v1928_v12 = vor.u32 %v2487_v10, %v1927_v9  ;;  %v2488_v15 = vld [vmem:[#allocation5 + $0xa0] sm:$0xf0]  ;;  %570 = vmatpush.bf16.msra.mxu1 %v1944_v7  ;;  %v1932_v16 = vor.u32 %v2486_v11, %v1929_v13  ;;  %v1915_v18 = vld [vmem:[#allocation5 + $0x78] sm:$0xf]  ;;  %v2483_v20 = vld [vmem:[#allocation5 + $0x7c] sm:$0xf] }
  0x48   : > { %584 = vmatpush.bf16.msra.mxu2 %v1948_v8  ;;  %v1936_v17 = vor.u32 %v2488_v15, %v1935_v14  ;;  %v2484_v19 = vld [vmem:[#allocation5 + $0x80] sm:$0xf0]  ;;  %v1917_v21 = vld [vmem:[#allocation5 + $0x84] sm:$0xf0]  ;;  %v1923_v22 = vld [vmem:[#allocation5 + $0x80] sm:$0xf] }
  0x49   : > { %v2485_v23 = vld [vmem:[#allocation5 + $0x88] sm:$0xf0]  ;;  %v1916_v24 = vor.u32 %v2484_v19, %v1915_v18  ;;  %v1920_v25 = vor.u32 %v2483_v20, %v1917_v21  ;;  %v1903_v27 = vld [vmem:[#allocation5 + $0x60] sm:$0xf]  ;;  %v2480_v29 = vld [vmem:[#allocation5 + $0x64] sm:$0xf] }
  0x4a   : > { %557 = vmatpush.bf16.msra.mxu0 %v1928_v12  ;;  %v1924_v26 = vor.u32 %v2485_v23, %v1923_v22  ;;  %v2481_v28 = vld [vmem:[#allocation5 + $0x68] sm:$0xf0]  ;;  %v1905_v30 = vld [vmem:[#allocation5 + $0x6c] sm:$0xf0]  ;;  %v1911_v31 = vld [vmem:[#allocation5 + $0x68] sm:$0xf] }
  0x4b   : > { %571 = vmatpush.bf16.msra.mxu1 %v1932_v16  ;;  %v2482_v32 = vld [vmem:[#allocation5 + $0x70] sm:$0xf0]  ;;  %v1904_v33 = vor.u32 %v2481_v28, %v1903_v27  ;;  %v1908_v34 = vor.u32 %v2480_v29, %v1905_v30  ;;  %v1891_v36 = vld [vmem:[#allocation5 + $0x48] sm:$0xf]  ;;  %v2477_v38 = vld [vmem:[#allocation5 + $0x4c] sm:$0xf] }
  0x4c   : > { %585 = vmatpush.bf16.msra.mxu2 %v1936_v17  ;;  %v1912_v35 = vor.u32 %v2482_v32, %v1911_v31  ;;  %v2478_v37 = vld [vmem:[#allocation5 + $0x50] sm:$0xf0]  ;;  %v1893_v39 = vld [vmem:[#allocation5 + $0x54] sm:$0xf0]  ;;  %v1899_v40 = vld [vmem:[#allocation5 + $0x50] sm:$0xf] }
  0x4d   : > { %v2479_v41 = vld [vmem:[#allocation5 + $0x58] sm:$0xf0]  ;;  %v1892_v42 = vor.u32 %v2478_v37, %v1891_v36  ;;  %v1879_v43 = vld [vmem:[#allocation5 + $0x30] sm:$0xf]  ;;  %v1896_v45 = vor.u32 %v2477_v38, %v1893_v39  ;;  %v2474_v47 = vld [vmem:[#allocation5 + $0x34] sm:$0xf] }
  0x4e   : > { %558 = vmatpush.bf16.msra.mxu0 %v1916_v24  ;;  %v2475_v44 = vld [vmem:[#allocation5 + $0x38] sm:$0xf0]  ;;  %v1900_v46 = vor.u32 %v2479_v41, %v1899_v40  ;;  %v2063_v48 = vld [vmem:[#allocation8 + $0xe0] sm:$0xf]  ;;  %v2522_v49 = vld [vmem:[#allocation8 + $0xec] sm:$0xf0] }
  0x4f   : > { %572 = vmatpush.bf16.msra.mxu1 %v1920_v25  ;;  %v1881_v50 = vld [vmem:[#allocation5 + $0x3c] sm:$0xf0]  ;;  %v1887_v51 = vld [vmem:[#allocation5 + $0x38] sm:$0xf]  ;;  %v2476_v52 = vld [vmem:[#allocation5 + $0x40] sm:$0xf0]  ;;  %v2064_v53 = vor.u32 %v2522_v49, %v2063_v48  ;;  %v1880_v56 = vor.u32 %v2475_v44, %v1879_v43 }
  0x50   : > { %586 = vmatpush.bf16.msra.mxu2 %v1924_v26  ;;  %v2047_v54 = vld [vmem:[#allocation8 + $0xc0] sm:$0xf]  ;;  %v2518_v55 = vld [vmem:[#allocation8 + $0xcc] sm:$0xf0]  ;;  %v1867_v57 = vld [vmem:[#allocation5 + $0x18] sm:$0xf]  ;;  %v1884_v60 = vor.u32 %v2474_v47, %v1881_v50  ;;  %v1888_v61 = vor.u32 %v2476_v52, %v1887_v51 }
  0x51   : > { %v2472_v58 = vld [vmem:[#allocation5 + $0x20] sm:$0xf0]  ;;  %1193 = vmatpush.bf16.msra.mxu3 %v2064_v53  ;;  %v2048_v59 = vor.u32 %v2518_v55, %v2047_v54  ;;  %v2471_v62 = vld [vmem:[#allocation5 + $0x1c] sm:$0xf]  ;;  %v1869_v63 = vld [vmem:[#allocation5 + $0x24] sm:$0xf0] }
  0x52   : > { %559 = vmatpush.bf16.msra.mxu0 %v1904_v33  ;;  %v1875_v0 = vld [vmem:[#allocation5 + $0x20] sm:$0xf]  ;;  %v2473_v1 = vld [vmem:[#allocation5 + $0x28] sm:$0xf0]  ;;  %v2031_v2 = vld [vmem:[#allocation8 + $0xa0] sm:$0xf]  ;;  %v1868_v4 = vor.u32 %v2472_v58, %v1867_v57  ;;  %v1872_v9 = vor.u32 %v2471_v62, %v1869_v63 }
  0x53   : > { %573 = vmatpush.bf16.msra.mxu1 %v1908_v34  ;;  %v2514_v3 = vld [vmem:[#allocation8 + $0xac] sm:$0xf0]  ;;  %v1855_v5 = vld [vmem:[#allocation5] sm:$0xf]  ;;  %v2469_v6 = vld [vmem:[#allocation5 + $0x8] sm:$0xf0]  ;;  %v1876_v10 = vor.u32 %v2473_v1, %v1875_v0 }
  0x54   : > { %587 = vmatpush.bf16.msra.mxu2 %v1912_v35  ;;  %v2468_v7 = vld [vmem:[#allocation5 + $0x4] sm:$0xf]  ;;  %v2032_v8 = vor.u32 %v2514_v3, %v2031_v2  ;;  %v1857_v11 = vld [vmem:[#allocation5 + $0xc] sm:$0xf0]  ;;  %v2510_v13 = vld [vmem:[#allocation8 + $0x8c] sm:$0xf0]  ;;  %v1856_v20 = vor.u32 %v2469_v6, %v1855_v5 }
  0x55   : > { %1194 = vmatpush.bf16.msra.mxu3 %v2048_v59  ;;  %v2015_v12 = vld [vmem:[#allocation8 + $0x80] sm:$0xf]  ;;  %v1863_v14 = vld [vmem:[#allocation5 + $0x8] sm:$0xf]  ;;  %v2470_v15 = vld [vmem:[#allocation5 + $0x10] sm:$0xf0]  ;;  %v1860_v24 = vor.u32 %v2468_v7, %v1857_v11 }
  0x56   : > { %560 = vmatpush.bf16.msra.mxu0 %v1892_v42  ;;  %v2191_v16 = vld [vmem:[#allocation8 + $0x1e0] sm:$0xf]  ;;  %v2554_v17 = vld [vmem:[#allocation8 + $0x1ec] sm:$0xf0]  ;;  %v2520_v18 = vld [vmem:[#allocation8 + $0xe4] sm:$0xf]  ;;  %v2016_v23 = vor.u32 %v2510_v13, %v2015_v12  ;;  %v1864_v25 = vor.u32 %v2470_v15, %v1863_v14 }
  0x57   : > { %574 = vmatpush.bf16.msra.mxu1 %v1896_v45  ;;  %v2065_v19 = vld [vmem:[#allocation8 + $0xf0] sm:$0xf0]  ;;  %v2319_v21 = vld [vmem:[#allocation8 + $0x2e0] sm:$0xf]  ;;  %v2586_v22 = vld [vmem:[#allocation8 + $0x2ec] sm:$0xf0]  ;;  %v2192_v27 = vor.u32 %v2554_v17, %v2191_v16 }
  0x58   : > { %588 = vmatpush.bf16.msra.mxu2 %v1900_v46  ;;  %v2467_v26 = vld [vmem:[%s3171_s17] sm:$0xff]  ;;  %v2068_v28 = vor.u32 %v2520_v18, %v2065_v19  ;;  %v2175_v29 = vld [vmem:[#allocation8 + $0x1c0] sm:$0xf]  ;;  %v2516_v33 = vld [vmem:[#allocation8 + $0xc4] sm:$0xf]  ;;  %v2320_v35 = vor.u32 %v2586_v22, %v2319_v21  ;;  %s1848_s15 = sshll.u32 %s3167_s16, 4 }
  0x59   : > { %1195 = vmatpush.bf16.msra.mxu3 %v2032_v8  ;;  %v1999_v30 = vld [vmem:[#allocation8 + $0x60] sm:$0xf]  ;;  %v2506_v31 = vld [vmem:[#allocation8 + $0x6c] sm:$0xf0]  ;;  %v2049_v34 = vld [vmem:[#allocation8 + $0xd0] sm:$0xf0] }
  0x5a   : > { %561 = vmatpush.bf16.msra.mxu0 %v1880_v56  ;;  %v2550_v32 = vld [vmem:[#allocation8 + $0x1cc] sm:$0xf0]  ;;  %v2303_v36 = vld [vmem:[#allocation8 + $0x2c0] sm:$0xf]  ;;  %v2000_v38 = vor.u32 %v2506_v31, %v1999_v30  ;;  %v2052_v40 = vor.u32 %v2516_v33, %v2049_v34  ;;  %v2512_v45 = vld [vmem:[#allocation8 + $0xa4] sm:$0xf] }
  0x5b   : > { %575 = vmatpush.bf16.msra.mxu1 %v1884_v60  ;;  %v2582_v37 = vld [vmem:[#allocation8 + $0x2cc] sm:$0xf0]  ;;  %v2176_v39 = vor.u32 %v2550_v32, %v2175_v29  ;;  %v2159_v41 = vld [vmem:[#allocation8 + $0x1a0] sm:$0xf]  ;;  %v2033_v46 = vld [vmem:[#allocation8 + $0xb0] sm:$0xf0] }
  0x5c   : > { %589 = vmatpush.bf16.msra.mxu2 %v1888_v61  ;;  %v1983_v42 = vld [vmem:[#allocation8 + $0x40] sm:$0xf]  ;;  %v2502_v43 = vld [vmem:[#allocation8 + $0x4c] sm:$0xf0]  ;;  %v2304_v47 = vor.u32 %v2582_v37, %v2303_v36  ;;  %v2036_v52 = vor.u32 %v2512_v45, %v2033_v46  ;;  %v2508_v57 = vld [vmem:[#allocation8 + $0x84] sm:$0xf] }
  0x5d   : > { %1196 = vmatpush.bf16.msra.mxu3 %v2016_v23  ;;  %v2546_v44 = vld [vmem:[#allocation8 + $0x1ac] sm:$0xf0]  ;;  %v2287_v48 = vld [vmem:[#allocation8 + $0x2a0] sm:$0xf]  ;;  %v1984_v50 = vor.u32 %v2502_v43, %v1983_v42  ;;  %v2017_v58 = vld [vmem:[#allocation8 + $0x90] sm:$0xf0] }
  0x5e   : > { %562 = vmatpush.bf16.msra.mxu0 %v1868_v4  ;;  %v2578_v49 = vld [vmem:[#allocation8 + $0x2ac] sm:$0xf0]  ;;  %v2160_v51 = vor.u32 %v2546_v44, %v2159_v41  ;;  %v2143_v53 = vld [vmem:[#allocation8 + $0x180] sm:$0xf]  ;;  %v2020_v1 = vor.u32 %v2508_v57, %v2017_v58  ;;  %v2504_v5 = vld [vmem:[#allocation8 + $0x64] sm:$0xf] }
  0x5f   : > { %576 = vmatpush.bf16.msra.mxu1 %v1872_v9  ;;  %v1967_v54 = vld [vmem:[#allocation8 + $0x20] sm:$0xf]  ;;  %v2498_v55 = vld [vmem:[#allocation8 + $0x2c] sm:$0xf0]  ;;  %v2288_v59 = vor.u32 %v2578_v49, %v2287_v48  ;;  %v2001_v6 = vld [vmem:[#allocation8 + $0x70] sm:$0xf0] }
  0x60   : > { %590 = vmatpush.bf16.msra.mxu2 %v1876_v10  ;;  %v2542_v56 = vld [vmem:[#allocation8 + $0x18c] sm:$0xf0]  ;;  %v2271_v60 = vld [vmem:[#allocation8 + $0x280] sm:$0xf]  ;;  %v1968_v63 = vor.u32 %v2498_v55, %v1967_v54  ;;  %v2552_v10 = vld [vmem:[#allocation8 + $0x1e4] sm:$0xf]  ;;  %v2004_v14 = vor.u32 %v2504_v5, %v2001_v6 }
  0x61   : > { %1197 = vmatpush.bf16.msra.mxu3 %v2000_v38  ;;  %v2574_v61 = vld [vmem:[#allocation8 + $0x28c] sm:$0xf0]  ;;  %v2127_v62 = vld [vmem:[#allocation8 + $0x160] sm:$0xf]  ;;  %v2144_v0 = vor.u32 %v2542_v56, %v2143_v53  ;;  %v2193_v11 = vld [vmem:[#allocation8 + $0x1f0] sm:$0xf0] }
  0x62   : > { %563 = vmatpush.bf16.msra.mxu0 %v1856_v20  ;;  %v2538_v2 = vld [vmem:[#allocation8 + $0x16c] sm:$0xf0]  ;;  %v1951_v3 = vld [vmem:[#allocation8] sm:$0xf]  ;;  %v2272_v7 = vor.u32 %v2574_v61, %v2271_v60  ;;  %v2500_v17 = vld [vmem:[#allocation8 + $0x44] sm:$0xf]  ;;  %v2196_v22 = vor.u32 %v2552_v10, %v2193_v11 }
  0x63   : > { %577 = vmatpush.bf16.msra.mxu1 %v1860_v24  ;;  %v2494_v4 = vld [vmem:[#allocation8 + $0xc] sm:$0xf0]  ;;  %v2255_v8 = vld [vmem:[#allocation8 + $0x260] sm:$0xf]  ;;  %v2128_v13 = vor.u32 %v2538_v2, %v2127_v62  ;;  %v1985_v18 = vld [vmem:[#allocation8 + $0x50] sm:$0xf0] }
  0x64   : > { %591 = vmatpush.bf16.msra.mxu2 %v1864_v25  ;;  %v2570_v9 = vld [vmem:[#allocation8 + $0x26c] sm:$0xf0]  ;;  %v1952_v12 = vor.u32 %v2494_v4, %v1951_v3  ;;  %v2111_v15 = vld [vmem:[#allocation8 + $0x140] sm:$0xf]  ;;  %v2548_v23 = vld [vmem:[#allocation8 + $0x1c4] sm:$0xf] }
  0x65   : > { %564 = vmatmul.bf16.vlgmr.msra.gmra.mxu0 %v2467_v26  ;;  %1198 = vmatpush.bf16.msra.mxu3 %v1984_v50  ;;  %v2534_v16 = vld [vmem:[#allocation8 + $0x14c] sm:$0xf0]  ;;  %v2256_v19 = vor.u32 %v2570_v9, %v2255_v8  ;;  %v2239_v20 = vld [vmem:[#allocation8 + $0x240] sm:$0xf]  ;;  %v2177_v24 = vld [vmem:[#allocation8 + $0x1d0] sm:$0xf0] }
  0x66   : > { %1207 = vmatpush.bf16.msrb.mxu0 %v2192_v27  ;;  %578 = vmatmul.bf16.vlgmr.msra.gmra.mxu1 %v2467_v26  ;;  %v2566_v21 = vld [vmem:[#allocation8 + $0x24c] sm:$0xf0]  ;;  %v2112_v25 = vor.u32 %v2534_v16, %v2111_v15  ;;  %v2095_v27 = vld [vmem:[#allocation8 + $0x120] sm:$0xf]  ;;  %v2496_v29 = vld [vmem:[#allocation8 + $0x24] sm:$0xf]  ;;  %v2180_v33 = vor.u32 %v2548_v23, %v2177_v24 }
  0x67   : > { %1221 = vmatpush.bf16.msrb.mxu1 %v2320_v35  ;;  %592 = vmatmul.bf16.vlgmr.msra.gmra.mxu2 %v2467_v26  ;;  %v1988_v26 = vor.u32 %v2500_v17, %v1985_v18  ;;  %v1969_v30 = vld [vmem:[#allocation8 + $0x30] sm:$0xf0]  ;;  %v2240_v31 = vor.u32 %v2566_v21, %v2239_v20  ;;  %v2223_v32 = vld [vmem:[#allocation8 + $0x220] sm:$0xf]  ;;  %v2562_v34 = vld [vmem:[#allocation8 + $0x22c] sm:$0xf0] }
  0x68   : > { %1235 = vmatpush.bf16.msrb.mxu2 %v2068_v28  ;;  %v2530_v28 = vld [vmem:[#allocation8 + $0x12c] sm:$0xf0]  ;;  %v2544_v35 = vld [vmem:[#allocation8 + $0x1a4] sm:$0xf]  ;;  %v2161_v36 = vld [vmem:[#allocation8 + $0x1b0] sm:$0xf0]  ;;  %v1972_v38 = vor.u32 %v2496_v29, %v1969_v30  ;;  %v2224_v45 = vor.u32 %v2562_v34, %v2223_v32 }
  0x69   : > { %1199 = vmatpush.bf16.msra.mxu3 %v1968_v63  ;;  %v2096_v37 = vor.u32 %v2530_v28, %v2095_v27  ;;  %v2492_v41 = vld [vmem:[#allocation8 + $0x4] sm:$0xf]  ;;  %v1953_v42 = vld [vmem:[#allocation8 + $0x10] sm:$0xf0]  ;;  %v2164_v46 = vor.u32 %v2544_v35, %v2161_v36  ;;  %v2555_v48 = vld [vmem:[#allocation8 + $0x1f4] sm:$0xf0] }
  0x6a   : > { %1208 = vmatpush.bf16.msrb.mxu0 %v2176_v39  ;;  %v2079_v39 = vld [vmem:[#allocation8 + $0x100] sm:$0xf]  ;;  %v2584_v43 = vld [vmem:[#allocation8 + $0x2e4] sm:$0xf]  ;;  %v2321_v44 = vld [vmem:[#allocation8 + $0x2f0] sm:$0xf0]  ;;  %v1956_v54 = vor.u32 %v2492_v41, %v1953_v42 }
  0x6b   : > { %1222 = vmatpush.bf16.msrb.mxu1 %v2304_v47  ;;  %v2199_v47 = vld [vmem:[#allocation8 + $0x1e8] sm:$0xf]  ;;  %v2207_v49 = vld [vmem:[#allocation8 + $0x200] sm:$0xf]  ;;  %v2558_v50 = vld [vmem:[#allocation8 + $0x20c] sm:$0xf0]  ;;  %v2324_v57 = vor.u32 %v2584_v43, %v2321_v44 }
  0x6c   : > { %1236 = vmatpush.bf16.msrb.mxu2 %v2052_v40  ;;  %v2526_v40 = vld [vmem:[#allocation8 + $0x10c] sm:$0xf0]  ;;  %v2071_v55 = vld [vmem:[#allocation8 + $0xe8] sm:$0xf]  ;;  %v2523_v56 = vld [vmem:[#allocation8 + $0xf4] sm:$0xf0]  ;;  %v2200_v58 = vor.u32 %v2555_v48, %v2199_v47  ;;  %v2208_v63 = vor.u32 %v2558_v50, %v2207_v49 }
  0x6d   : > { %1200 = vmatpush.bf16.msra.mxu3 %v1952_v12  ;;  %v2080_v53 = vor.u32 %v2526_v40, %v2079_v39  ;;  %v2305_v60 = vld [vmem:[#allocation8 + $0x2d0] sm:$0xf0]  ;;  %v2183_v61 = vld [vmem:[#allocation8 + $0x1c8] sm:$0xf]  ;;  %v2551_v62 = vld [vmem:[#allocation8 + $0x1d4] sm:$0xf0] }
  0x6e   : > { %1209 = vmatpush.bf16.msrb.mxu0 %v2160_v51  ;;  %v2540_v51 = vld [vmem:[#allocation8 + $0x184] sm:$0xf]  ;;  %v2055_v2 = vld [vmem:[#allocation8 + $0xc8] sm:$0xf]  ;;  %v2519_v3 = vld [vmem:[#allocation8 + $0xd4] sm:$0xf0]  ;;  %v2184_v5 = vor.u32 %v2551_v62, %v2183_v61 }
  0x6f   : > { %1223 = vmatpush.bf16.msrb.mxu1 %v2288_v59  ;;  %v2580_v59 = vld [vmem:[#allocation8 + $0x2c4] sm:$0xf]  ;;  %v2167_v8 = vld [vmem:[#allocation8 + $0x1a8] sm:$0xf]  ;;  %v2547_v9 = vld [vmem:[#allocation8 + $0x1b4] sm:$0xf0]  ;;  %v2056_v10 = vor.u32 %v2519_v3, %v2055_v2 }
  0x70   : > { %1237 = vmatpush.bf16.msrb.mxu2 %v2036_v52  ;;  %v2145_v52 = vld [vmem:[#allocation8 + $0x190] sm:$0xf0]  ;;  %v2308_v4 = vor.u32 %v2580_v59, %v2305_v60  ;;  %v2576_v6 = vld [vmem:[#allocation8 + $0x2a4] sm:$0xf]  ;;  %v2168_v12 = vor.u32 %v2547_v9, %v2167_v8  ;;  %v2151_v15 = vld [vmem:[#allocation8 + $0x188] sm:$0xf] }
  0x71   : > { %1249 = vmatpush.bf16.msrb.mxu3 %v2196_v22  ;;  %v2543_v16 = vld [vmem:[#allocation8 + $0x194] sm:$0xf0]  ;;  %v2536_v22 = vld [vmem:[#allocation8 + $0x164] sm:$0xf]  ;;  %v2129_v23 = vld [vmem:[#allocation8 + $0x170] sm:$0xf0] }
  0x72   : > { %1210 = vmatpush.bf16.msrb.mxu0 %v2144_v0  ;;  %v2148_v0 = vor.u32 %v2540_v51, %v2145_v52  ;;  %v2152_v18 = vor.u32 %v2543_v16, %v2151_v15  ;;  %v2515_v20 = vld [vmem:[#allocation8 + $0xb4] sm:$0xf0]  ;;  %v2568_v24 = vld [vmem:[#allocation8 + $0x264] sm:$0xf]  ;;  %v2135_v27 = vld [vmem:[#allocation8 + $0x168] sm:$0xf] }
  0x73   : > { %1224 = vmatpush.bf16.msrb.mxu1 %v2272_v7  ;;  %v2289_v7 = vld [vmem:[#allocation8 + $0x2b0] sm:$0xf0]  ;;  %v2539_v28 = vld [vmem:[#allocation8 + $0x174] sm:$0xf0]  ;;  %v2532_v34 = vld [vmem:[#allocation8 + $0x144] sm:$0xf] }
  0x74   : > { %1238 = vmatpush.bf16.msrb.mxu2 %v2020_v1  ;;  %v2072_v1 = vor.u32 %v2523_v56, %v2071_v55  ;;  %v2292_v11 = vor.u32 %v2576_v6, %v2289_v7  ;;  %v2136_v30 = vor.u32 %v2539_v28, %v2135_v27  ;;  %v2511_v32 = vld [vmem:[#allocation8 + $0x94] sm:$0xf0]  ;;  %v2113_v35 = vld [vmem:[#allocation8 + $0x150] sm:$0xf0]  ;;  %v2564_v36 = vld [vmem:[#allocation8 + $0x244] sm:$0xf] }
  0x75   : > { %1250 = vmatpush.bf16.msrb.mxu3 %v2180_v33  ;;  %v2119_v39 = vld [vmem:[#allocation8 + $0x148] sm:$0xf]  ;;  %v2535_v40 = vld [vmem:[#allocation8 + $0x154] sm:$0xf0]  ;;  %v2097_v47 = vld [vmem:[#allocation8 + $0x130] sm:$0xf0] }
  0x76   : > { %1211 = vmatpush.bf16.msrb.mxu0 %v2128_v13  ;;  %v2572_v13 = vld [vmem:[#allocation8 + $0x284] sm:$0xf]  ;;  %v2120_v42 = vor.u32 %v2535_v40, %v2119_v39  ;;  %v2007_v43 = vld [vmem:[#allocation8 + $0x68] sm:$0xf]  ;;  %v2507_v44 = vld [vmem:[#allocation8 + $0x74] sm:$0xf0] }
  0x77   : > { %1225 = vmatpush.bf16.msrb.mxu1 %v2256_v19  ;;  %v2039_v19 = vld [vmem:[#allocation8 + $0xa8] sm:$0xf]  ;;  %v2560_v48 = vld [vmem:[#allocation8 + $0x224] sm:$0xf]  ;;  %v2225_v50 = vld [vmem:[#allocation8 + $0x230] sm:$0xf0] }
  0x78   : > { %1239 = vmatpush.bf16.msrb.mxu2 %v2004_v14  ;;  %v2273_v14 = vld [vmem:[#allocation8 + $0x290] sm:$0xf0]  ;;  %v2040_v21 = vor.u32 %v2515_v20, %v2039_v19  ;;  %v2103_v51 = vld [vmem:[#allocation8 + $0x128] sm:$0xf]  ;;  %v2531_v52 = vld [vmem:[#allocation8 + $0x134] sm:$0xf0] }
  0x79   : > { %1251 = vmatpush.bf16.msrb.mxu3 %v2164_v46  ;;  %v2276_v17 = vor.u32 %v2572_v13, %v2273_v14  ;;  %v2528_v46 = vld [vmem:[#allocation8 + $0x124] sm:$0xf]  ;;  %v1991_v55 = vld [vmem:[#allocation8 + $0x48] sm:$0xf]  ;;  %v2503_v56 = vld [vmem:[#allocation8 + $0x54] sm:$0xf0] }
  0x7a   : > { %1212 = vmatpush.bf16.msrb.mxu0 %v2112_v25  ;;  %v2132_v25 = vor.u32 %v2536_v22, %v2129_v23  ;;  %v2100_v49 = vor.u32 %v2528_v46, %v2097_v47  ;;  %v2081_v59 = vld [vmem:[#allocation8 + $0x110] sm:$0xf0]  ;;  %v2556_v60 = vld [vmem:[#allocation8 + $0x204] sm:$0xf]  ;;  %v1975_v3 = vld [vmem:[#allocation8 + $0x28] sm:$0xf] }
  0x7b   : > { %1226 = vmatpush.bf16.msrb.mxu1 %v2240_v31  ;;  %v2023_v31 = vld [vmem:[#allocation8 + $0x88] sm:$0xf]  ;;  %v2209_v62 = vld [vmem:[#allocation8 + $0x210] sm:$0xf0]  ;;  %v2495_v7 = vld [vmem:[#allocation8 + $0x14] sm:$0xf0] }
  0x7c   : > { %1240 = vmatpush.bf16.msrb.mxu2 %v1988_v26  ;;  %v2257_v26 = vld [vmem:[#allocation8 + $0x270] sm:$0xf0]  ;;  %v2024_v33 = vor.u32 %v2511_v32, %v2023_v31  ;;  %v1959_v6 = vld [vmem:[#allocation8 + $0x8] sm:$0xf]  ;;  %v414_v9 = vld [vmem:[#allocation7] sm:$0x7] }
  0x7d   : > { %1252 = vmatpush.bf16.msrb.mxu3 %v2148_v0  ;;  %v2260_v29 = vor.u32 %v2568_v24, %v2257_v26  ;;  %v2527_v0 = vld [vmem:[#allocation8 + $0x114] sm:$0xf0]  ;;  %v1960_v8 = vor.u32 %v2495_v7, %v1959_v6  ;;  %v417_v13 = vperm.slane %v414_v9, 1  ;;  %v2521_v23 = vld [vmem:[#allocation8 + $0xec] sm:$0xf]  ;;  %s2620_s20 = sshll.u32 %s3068_s8, 4 }
  0x7e   : > { %1213 = vmatpush.bf16.msrb.mxu0 %v2096_v37  ;;  %v2116_v37 = vor.u32 %v2532_v34, %v2113_v35  ;;  %v2587_v22 = vld [vmem:[#allocation8 + $0x2f4] sm:$0xf0]  ;;  %v2585_v26 = vld [vmem:[#allocation8 + $0x2ec] sm:$0xf]  ;;  %v2329_v27 = vld [vmem:[#allocation8 + $0x2f8] sm:$0xf0]  ;;  %s1705_s14 = scalar_lea.hbm %s3258_s7, %s2620_s20 }
  0x7f   : > { %1227 = vmatpush.bf16.msrb.mxu1 %v2224_v45  ;;  %v2008_v45 = vor.u32 %v2507_v44, %v2007_v43  ;;  %v2332_v35 = vor.u32 %v2585_v26, %v2329_v27  ;;  %v2313_v43 = vld [vmem:[#allocation8 + $0x2d8] sm:$0xf0]  ;;  %v2553_v47 = vld [vmem:[#allocation8 + $0x1ec] sm:$0xf]  ;;  %v2567_v27 = vld [vmem:[#allocation8 + $0x254] sm:$0xf0] }
  0x80   : > { %1241 = vmatpush.bf16.msrb.mxu2 %v1972_v38  ;;  %v2241_v38 = vld [vmem:[#allocation8 + $0x250] sm:$0xf0]  ;;  %v2573_v6 = vld [vmem:[#allocation8 + $0x28c] sm:$0xf]  ;;  %v2281_v7 = vld [vmem:[#allocation8 + $0x298] sm:$0xf0] }
  0x81   : > { %1253 = vmatpush.bf16.msrb.mxu3 %v2132_v25  ;;  %v2244_v41 = vor.u32 %v2564_v36, %v2241_v38  ;;  %v2073_v25 = vld [vmem:[#allocation8 + $0xf8] sm:$0xf0]  ;;  %v2311_v36 = vld [vmem:[#allocation8 + $0x2c8] sm:$0xf]  ;;  %v2517_v38 = vld [vmem:[#allocation8 + $0xcc] sm:$0xf] }
  0x82   : > { %1214 = vmatpush.bf16.msrb.mxu0 %v2080_v53  ;;  %v2228_v53 = vor.u32 %v2560_v48, %v2225_v50  ;;  %v2076_v34 = vor.u32 %v2521_v23, %v2073_v25  ;;  %v2201_v48 = vld [vmem:[#allocation8 + $0x1f8] sm:$0xf0]  ;;  %v2247_v25 = vld [vmem:[#allocation8 + $0x248] sm:$0xf]  ;;  %s377_s18 = scalar_lea.vmem [#allocation13], %s1848_s15  ;;  %s1708_s30 = sshll.u32 %s1705_s14, 4  ;;  %s1709_s30 = int_to_ptr.hbm [resolvable:$true] %s1708_s30 }
  0x83   : > { %1228 = vmatpush.bf16.msrb.mxu1 %v2208_v63  ;;  %v2087_v63 = vld [vmem:[#allocation8 + $0x108] sm:$0xf]  ;;  %s1706_s19 = sshll.u32 %s377_s18, 4  ;;  %s1694_s29 = scalar_lea.sflag [#allocation4], %s3167_s16  ;;  %s1707_s19 = int_to_ptr.vmem [resolvable:$true] %s1706_s19 }
  0x84   : > { %1242 = vmatpush.bf16.msrb.mxu2 %v1956_v54  ;;  %v2104_v54 = vor.u32 %v2531_v52, %v2103_v51  ;;  %v2088_v2 = vor.u32 %v2527_v0, %v2087_v63  ;;  %v2579_v52 = vld [vmem:[#allocation8 + $0x2b4] sm:$0xf0]  ;;  %v2185_v63 = vld [vmem:[#allocation8 + $0x1d8] sm:$0xf0]  ;;  %s2925_s8 = sshra.s32 %s1709_s30, 4  ;;  %s2931_s9 = scalar_lea.hbm %s3258_s7, 32  ;;  %s2926_s8 = int_to_ptr.hbm [resolvable:$true] %s2925_s8 }
  0x85   : > { %1254 = vmatpush.bf16.msrb.mxu3 %v2116_v37  ;;  %v2583_v37 = vld [vmem:[#allocation8 + $0x2d4] sm:$0xf0]  ;;  %s2927_s22 = scalar_lea.hbm %s2926_s8, 16  ;;  %p2932_p12 = scmp.lt.s32.totalorder %s2926_s8, %s3258_s7 }
  0x86   : > { %1263 = vmatpush.bf16.msra.mxu0 %v2324_v57  ;;  %v1992_v57 = vor.u32 %v2503_v56, %v1991_v55  ;;  %v2312_v46 = vor.u32 %v2583_v37, %v2311_v36  ;;  %v2248_v36 = vor.u32 %v2567_v27, %v2247_v25  ;;  %v2608_v25 = vld [vmem:[#allocation11 + $0xa0] sm:$0xff]  ;;  %p2928_p1 = scmp.ne.s32.totalorder %s2926_s8, %s2927_s22  ;;  %p2933_p8 = scmp.lt.s32.totalorder %s2931_s9, %s2927_s22 }
  0x87   : > { %1277 = vmatpush.bf16.msra.mxu1 %v2072_v1  ;;  %v2212_v1 = vor.u32 %v2556_v60, %v2209_v62  ;;  %v2549_v62 = vld [vmem:[#allocation8 + $0x1cc] sm:$0xf]  ;;  %v2616_v27 = vld [vmem:[#allocation11 + $0xe0] sm:$0xff] }
  0x88   : > { %1291 = vmatpush.bf16.msra.mxu2 %v2200_v58  ;;  %v2524_v58 = vld [vmem:[#allocation8 + $0x104] sm:$0xf]  ;;  %p2929_p3 = pnand %p2928_p1, %p3133_p13  ;;  %p2934_p7 = por %p2933_p8, %p2932_p12 }
  0x89   : > { %1255 = vmatpush.bf16.msrb.mxu3 %v2100_v49  ;;  %v2084_v61 = vor.u32 %v2524_v58, %v2081_v59  ;;  %v2295_v49 = vld [vmem:[#allocation8 + $0x2a8] sm:$0xf]  ;;  %v2297_v58 = vld [vmem:[#allocation8 + $0x2b8] sm:$0xf0]  ;;  %v2204_v59 = vor.u32 %v2553_v47, %v2201_v48  ;;  %v2533_v47 = vld [vmem:[#allocation8 + $0x14c] sm:$0xf] }
  0x8a   : > { %1264 = vmatpush.bf16.msra.mxu0 %v2308_v4  ;;  %v2499_v4 = vld [vmem:[#allocation8 + $0x34] sm:$0xf0]  ;;  %v2121_v48 = vld [vmem:[#allocation8 + $0x158] sm:$0xf0]  ;;  %p2930_p5 = pneg %p2929_p3 }
  0x8b   : > { %1278 = vmatpush.bf16.msra.mxu1 %v2056_v10 }
  0x8c   : > { %1292 = vmatpush.bf16.msra.mxu2 %v2184_v5  ;;  %v1976_v5 = vor.u32 %v2499_v4, %v1975_v3  ;;  %v2575_v3 = vld [vmem:[#allocation8 + $0x294] sm:$0xf0]  ;;  %v2509_v4 = vld [vmem:[#allocation8 + $0x8c] sm:$0xf]  ;;  %p2935_p9 = pnand %p2934_p7, %p2930_p5 }
  0x8d   : > { %1256 = vmatpush.bf16.msrb.mxu3 %v2084_v61  ;;  %v2296_v61 = vor.u32 %v2579_v52, %v2295_v49 }
  0x8e   : > { %1265 = vmatpush.bf16.msra.mxu0 %v2292_v11 }
  0x8f   : > { %1279 = vmatpush.bf16.msra.mxu1 %v2040_v21  ;;  %v2327_v21 = vld [vmem:[#allocation8 + $0x2e8] sm:$0xf] }
  0x90   : > { %1293 = vmatpush.bf16.msra.mxu2 %v2168_v12  ;;  %v416_v12 = vperm.slane %v414_v9, 0  ;;  %v2328_v32 = vor.u32 %v2587_v22, %v2327_v21  ;;  %v2541_v21 = vld [vmem:[#allocation8 + $0x18c] sm:$0xf]  ;;  %v2153_v22 = vld [vmem:[#allocation8 + $0x198] sm:$0xf0] }
  0x92   : > { %1266 = vmatpush.bf16.msra.mxu0 %v2276_v17  ;;  %v418_v17 = vperm.slane %v414_v9, 2 }
  0x93   : > { %1280 = vmatpush.bf16.msra.mxu1 %v2024_v33 }
  0x94   : > { %1294 = vmatpush.bf16.msra.mxu2 %v2152_v18 }
  0x96   : > { %1267 = vmatpush.bf16.msra.mxu0 %v2260_v29 }
  0x97   : > { %1281 = vmatpush.bf16.msra.mxu1 %v2008_v45 }
  0x98   : > { %1295 = vmatpush.bf16.msra.mxu2 %v2136_v30 }
  0x9a   : > { %1268 = vmatpush.bf16.msra.mxu0 %v2244_v41  ;;  %v2057_v41 = vld [vmem:[#allocation8 + $0xd8] sm:$0xf0] }
  0x9b   : > { %1282 = vmatpush.bf16.msra.mxu1 %v1992_v57  ;;  %v2060_v50 = vor.u32 %v2517_v38, %v2057_v41  ;;  %v2577_v57 = vld [vmem:[#allocation8 + $0x2ac] sm:$0xf]  ;;  %v2231_v38 = vld [vmem:[#allocation8 + $0x228] sm:$0xf]  ;;  %v2563_v41 = vld [vmem:[#allocation8 + $0x234] sm:$0xf0] }
  0x9c   : > { %1296 = vmatpush.bf16.msra.mxu2 %v2120_v42  ;;  %v2581_v42 = vld [vmem:[#allocation8 + $0x2cc] sm:$0xf]  ;;  %v2232_v49 = vor.u32 %v2563_v41, %v2231_v38  ;;  %v2614_v38 = vld [vmem:[#allocation11 + $0xd0] sm:$0xff] }
  0x9d   : > { %v2316_v51 = vor.u32 %v2581_v42, %v2313_v43  ;;  %v2497_v42 = vld [vmem:[#allocation8 + $0x2c] sm:$0xf]  ;;  %v1977_v43 = vld [vmem:[#allocation8 + $0x38] sm:$0xf0] }
  0x9e   : > { %1269 = vmatpush.bf16.msra.mxu0 %v2228_v53  ;;  %v2513_v53 = vld [vmem:[#allocation8 + $0xac] sm:$0xf] }
  0x9f   : > { %1283 = vmatpush.bf16.msra.mxu1 %v1976_v5  ;;  %v2025_v5 = vld [vmem:[#allocation8 + $0x98] sm:$0xf0] }
  0xa0   : > { %1297 = vmatpush.bf16.msra.mxu2 %v2104_v54  ;;  %v2041_v54 = vld [vmem:[#allocation8 + $0xb8] sm:$0xf0] }
  0xa1   : > { %v2044_v0 = vor.u32 %v2513_v53, %v2041_v54  ;;  %v2559_v53 = vld [vmem:[#allocation8 + $0x214] sm:$0xf0]  ;;  %v2493_v54 = vld [vmem:[#allocation8 + $0xc] sm:$0xf] }
  0xa2   : > { %1270 = vmatpush.bf16.msra.mxu0 %v2212_v1  ;;  %v2300_v1 = vor.u32 %v2577_v57, %v2297_v58  ;;  %v2557_v57 = vld [vmem:[#allocation8 + $0x20c] sm:$0xf]  ;;  %v2217_v58 = vld [vmem:[#allocation8 + $0x218] sm:$0xf0] }
  0xa3   : > { %1284 = vmatpush.bf16.msra.mxu1 %v1960_v8  ;;  %v2188_v8 = vor.u32 %v2549_v62, %v2185_v63 }
  0xa4   : > { %1298 = vmatpush.bf16.msra.mxu2 %v2088_v2  ;;  %v2279_v2 = vld [vmem:[#allocation8 + $0x288] sm:$0xf] }
  0xa5   : > { %v2280_v9 = vor.u32 %v2575_v3, %v2279_v2  ;;  %v2525_v3 = vld [vmem:[#allocation8 + $0x10c] sm:$0xf] }
  0xe2   : > { %v565_v10 = vpop.f32.mrf.mxu0 }
  0xe3   : > { %v579_v11 = vpop.f32.mrf.mxu1  ;;  %v566_v14 = vadd.f32 %v565_v10, %v416_v12  ;;  %v2545_v10 = vld [vmem:[#allocation8 + $0x1ac] sm:$0xf] }
  0xe4   : > { %v580_v16 = vadd.f32 %v579_v11, %v417_v13  ;;  %v2169_v11 = vld [vmem:[#allocation8 + $0x1b8] sm:$0xf0] }
  0xe5   : > { %v598_v28 = vmax.f32 %v566_v14, 0.0  ;;  %v2263_v14 = vld [vmem:[#allocation8 + $0x268] sm:$0xf] }
  0xe6   : > { %v599_v30 = vmax.f32 %v580_v16, 0.0  ;;  %v2505_v16 = vld [vmem:[#allocation8 + $0x6c] sm:$0xf] }
  0xea   : > { %v593_v15 = vpop.f32.mrf.mxu2  ;;  %v567_v18 = vpop.f32.mrf.mxu0 }
  0xeb   : > { %v568_v19 = vadd.f32 %v567_v18, %v416_v12  ;;  %v581_v20 = vpop.f32.mrf.mxu1  ;;  %v594_v39 = vadd.f32 %v593_v15, %v418_v17  ;;  %v2028_v12 = vor.u32 %v2509_v4, %v2025_v5  ;;  %v2571_v15 = vld [vmem:[#allocation8 + $0x274] sm:$0xf0]  ;;  %v2172_v18 = vor.u32 %v2545_v10, %v2169_v11  ;;  %v2089_v4 = vld [vmem:[#allocation8 + $0x118] sm:$0xf0] }
  0xec   : > { %v582_v24 = vadd.f32 %v581_v20, %v417_v13  ;;  %v2284_v13 = vor.u32 %v2573_v6, %v2281_v7  ;;  %v2265_v20 = vld [vmem:[#allocation8 + $0x278] sm:$0xf0]  ;;  %v2264_v23 = vor.u32 %v2571_v15, %v2263_v14  ;;  %v2594_v5 = vld [vmem:[#allocation11 + $0x30] sm:$0xff]  ;;  %v2092_v6 = vor.u32 %v2525_v3, %v2089_v4  ;;  %v2593_v7 = vld [vmem:[#allocation11 + $0x28] sm:$0xff] }
  0xed   : > { %v601_v29 = vmax.f32 %v568_v19, 0.0  ;;  %v600_v55 = vmax.f32 %v594_v39, 0.0  ;;  %v2569_v19 = vld [vmem:[#allocation8 + $0x26c] sm:$0xf]  ;;  %v2591_v10 = vld [vmem:[#allocation11 + $0x18] sm:$0xff]  ;;  %v2602_v11 = vld [vmem:[#allocation11 + $0x70] sm:$0xff] }
  0xee   : > { %v602_v31 = vmax.f32 %v582_v24, 0.0  ;;  %v2268_v26 = vor.u32 %v2569_v19, %v2265_v20  ;;  %v2588_v14 = vld [vmem:[#allocation11] sm:$0xff]  ;;  %v2599_v15 = vld [vmem:[#allocation11 + $0x58] sm:$0xff]  ;;  %v2618_v19 = vld [vmem:[#allocation11 + $0xf0] sm:$0xff] }
  0xef   : > { %v3190_v33 = vpack.c.bf16 %v601_v29, %v598_v28  ;;  %v2501_v28 = vld [vmem:[#allocation8 + $0x4c] sm:$0xf]  ;;  %v1993_v29 = vld [vmem:[#allocation8 + $0x58] sm:$0xf0] }
  0xf0   : > { %v3192_v40 = vpack.c.bf16 %v602_v31, %v599_v30  ;;  %v2156_v30 = vor.u32 %v2541_v21, %v2153_v22  ;;  %v2565_v31 = vld [vmem:[#allocation8 + $0x24c] sm:$0xf]  ;;  %v1996_v37 = vor.u32 %v2501_v28, %v1993_v29 }
  0xf1   : > { %1201 = vmatmul.bf16.vlgmr.msra.gmra.mxu3 %v3190_v33  ;;  %1243 = vmatmul.bf16.vlgmr.msrb.gmra.mxu2 %v3190_v33  ;;  %v2609_v20 = vld [vmem:[#allocation11 + $0xa8] sm:$0xff] }
  0xf2   : > { %v595_v44 = vpop.f32.mrf.mxu2  ;;  %1215 = vmatmul.bf16.vlgmr.msrb.gmra.mxu0 %v3192_v40  ;;  %1305 = vmatpush.bf16.msra.mxu3 %v2328_v32  ;;  %v2249_v32 = vld [vmem:[#allocation8 + $0x258] sm:$0xf0]  ;;  %v2597_v21 = vld [vmem:[#allocation11 + $0x48] sm:$0xff] }
  0xf3   : > { %v596_v45 = vadd.f32 %v595_v44, %v418_v17  ;;  %1319 = vmatpush.bf16.msrb.mxu0 %v2076_v34  ;;  %1347 = vmatpush.bf16.msrb.mxu2 %v2332_v35  ;;  %v2009_v17 = vld [vmem:[#allocation8 + $0x78] sm:$0xf0]  ;;  %v2537_v34 = vld [vmem:[#allocation8 + $0x16c] sm:$0xf]  ;;  %v2252_v39 = vor.u32 %v2565_v31, %v2249_v32 }
  0xf4   : > { %v2012_v24 = vor.u32 %v2505_v16, %v2009_v17  ;;  %v2137_v35 = vld [vmem:[#allocation8 + $0x178] sm:$0xf0]  ;;  %v2610_v17 = vld [vmem:[#allocation11 + $0xb0] sm:$0xff]  ;;  %v2617_v22 = vld [vmem:[#allocation11 + $0xe8] sm:$0xff] }
  0xf5   : > { %v603_v56 = vmax.f32 %v596_v45, 0.0  ;;  %v2140_v44 = vor.u32 %v2537_v34, %v2137_v35  ;;  %v2561_v45 = vld [vmem:[#allocation8 + $0x22c] sm:$0xf]  ;;  %v2619_v16 = vld [vmem:[#allocation11 + $0xf8] sm:$0xff] }
  0xf6   : > { %1306 = vmatpush.bf16.msra.mxu3 %v2312_v46  ;;  %v2233_v46 = vld [vmem:[#allocation8 + $0x238] sm:$0xf0] }
  0xf7   : > { %v3197_v60 = vpack.c.bf16 %v603_v56, %v600_v55  ;;  %1320 = vmatpush.bf16.msrb.mxu0 %v2060_v50  ;;  %1348 = vmatpush.bf16.msrb.mxu2 %v2316_v51  ;;  %v1980_v50 = vor.u32 %v2497_v42, %v1977_v43  ;;  %v2215_v51 = vld [vmem:[#allocation8 + $0x208] sm:$0xf]  ;;  %v2236_v52 = vor.u32 %v2561_v45, %v2233_v46  ;;  %v1961_v55 = vld [vmem:[#allocation8 + $0x18] sm:$0xf0]  ;;  %v2605_v43 = vld [vmem:[#allocation11 + $0x88] sm:$0xff] }
  0xf8   : > { %v2124_v56 = vor.u32 %v2533_v47, %v2121_v48  ;;  %v2216_v62 = vor.u32 %v2559_v53, %v2215_v51  ;;  %v1964_v63 = vor.u32 %v2493_v54, %v1961_v55  ;;  %v2607_v31 = vld [vmem:[#allocation11 + $0x98] sm:$0xff]  ;;  %v2613_v46 = vld [vmem:[#allocation11 + $0xc8] sm:$0xff] }
  0xf9   : > { %1229 = vmatmul.bf16.vlgmr.msrb.gmra.mxu1 %v3197_v60  ;;  %v2615_v34 = vld [vmem:[#allocation11 + $0xd8] sm:$0xff] }
  0xfa   : > { %1333 = vmatpush.bf16.msrb.mxu1 %v2204_v59  ;;  %1307 = vmatpush.bf16.msra.mxu3 %v2296_v61  ;;  %v2529_v59 = vld [vmem:[#allocation8 + $0x12c] sm:$0xf]  ;;  %v2105_v61 = vld [vmem:[#allocation8 + $0x138] sm:$0xf0] }
  0xfb   : > { %1321 = vmatpush.bf16.msrb.mxu0 %v2044_v0  ;;  %1349 = vmatpush.bf16.msrb.mxu2 %v2300_v1  ;;  %v2220_v0 = vor.u32 %v2557_v57, %v2217_v58  ;;  %v2595_v1 = vld [vmem:[#allocation11 + $0x38] sm:$0xff]  ;;  %v2108_v2 = vor.u32 %v2529_v59, %v2105_v61 }
  0xfe   : > { %1334 = vmatpush.bf16.msrb.mxu1 %v2188_v8  ;;  %1308 = vmatpush.bf16.msra.mxu3 %v2280_v9  ;;  %v2592_v8 = vld [vmem:[#allocation11 + $0x20] sm:$0xff]  ;;  %v2603_v9 = vld [vmem:[#allocation11 + $0x78] sm:$0xff] }
  0xff   : > { %1322 = vmatpush.bf16.msrb.mxu0 %v2028_v12  ;;  %1350 = vmatpush.bf16.msrb.mxu2 %v2284_v13  ;;  %v2590_v12 = vld [vmem:[#allocation11 + $0x10] sm:$0xff]  ;;  %v2601_v13 = vld [vmem:[#allocation11 + $0x68] sm:$0xff] }
 0x101   : > { %1257 = vmatmul.bf16.vlgmr.msrb.gmra.mxu3 %v3192_v40  ;;  %1299 = vmatmul.bf16.vlgmr.msra.gmra.mxu2 %v3192_v40 }
 0x102   : > { %1335 = vmatpush.bf16.msrb.mxu1 %v2172_v18  ;;  %1271 = vmatmul.bf16.vlgmr.msra.gmra.mxu0 %v3197_v60  ;;  %v2598_v18 = vld [vmem:[#allocation11 + $0x50] sm:$0xff] }
 0x103   : > { %1309 = vmatpush.bf16.msra.mxu3 %v2264_v23  ;;  %1323 = vmatpush.bf16.msrb.mxu0 %v2012_v24  ;;  %v3208_v24 = vld [vmem:[#allocation10] sm:$0xf] }
 0x104   : > { %1351 = vmatpush.bf16.msrb.mxu2 %v2268_v26  ;;  %v2596_v26 = vld [vmem:[#allocation11 + $0x40] sm:$0xff]  ;;  %v705_v28 = vperm.slane %v3208_v24, 0  ;;  %v706_v54 = vperm.slane %v3208_v24, 1 }
 0x106   : > { %1336 = vmatpush.bf16.msrb.mxu1 %v2156_v30 }
 0x107   : > { %1310 = vmatpush.bf16.msra.mxu3 %v2248_v36  ;;  %1324 = vmatpush.bf16.msrb.mxu0 %v1996_v37  ;;  %v2606_v37 = vld [vmem:[#allocation11 + $0x90] sm:$0xff] }
 0x108   : > { %1352 = vmatpush.bf16.msrb.mxu2 %v2252_v39 }
 0x109   : > { %1285 = vmatmul.bf16.vlgmr.msra.gmra.mxu1 %v3190_v33 }
 0x10a   : > { %1337 = vmatpush.bf16.msrb.mxu1 %v2140_v44 }
 0x10b   : > { %1311 = vmatpush.bf16.msra.mxu3 %v2232_v49  ;;  %1325 = vmatpush.bf16.msrb.mxu0 %v1980_v50  ;;  %v2604_v50 = vld [vmem:[#allocation11 + $0x80] sm:$0xff] }
 0x10c   : > { %1353 = vmatpush.bf16.msrb.mxu2 %v2236_v52  ;;  %v2612_v52 = vld [vmem:[#allocation11 + $0xc0] sm:$0xff] }
 0x10e   : > { %1338 = vmatpush.bf16.msrb.mxu1 %v2124_v56 }
 0x10f   : > { %1312 = vmatpush.bf16.msra.mxu3 %v2216_v62  ;;  %1326 = vmatpush.bf16.msrb.mxu0 %v1964_v63 }
 0x110   : > { %1354 = vmatpush.bf16.msrb.mxu2 %v2220_v0 }
 0x112   : > { %1339 = vmatpush.bf16.msrb.mxu1 %v2108_v2  ;;  %1313 = vmatmul.bf16.vlgmr.msra.gmra.mxu3 %v3197_v60 }
 0x113   : > { %1633 = vmatpush.bf16.msrb.mxu3 %v2595_v1  ;;  %1327 = vmatmul.bf16.vlgmr.msrb.gmra.mxu0 %v3190_v33  ;;  %v2589_v33 = vld [vmem:[#allocation11 + $0x8] sm:$0xff] }
 0x114   : > { %1355 = vmatmul.bf16.vlgmr.msrb.gmra.mxu2 %v3197_v60  ;;  %1647 = vmatpush.bf16.msra.mxu0 %v2603_v9  ;;  %v2600_v60 = vld [vmem:[#allocation11 + $0x60] sm:$0xff] }
 0x115   : > { %1675 = vmatpush.bf16.msra.mxu2 %v2619_v16 }
 0x116   : > { %1340 = vmatpush.bf16.msrb.mxu1 %v2092_v6 }
 0x117   : > { %1634 = vmatpush.bf16.msrb.mxu3 %v2594_v5 }
 0x118   : > { %1648 = vmatpush.bf16.msra.mxu0 %v2602_v11 }
 0x119   : > { %1341 = vmatmul.bf16.vlgmr.msrb.gmra.mxu1 %v3192_v40  ;;  %v2611_v40 = vld [vmem:[#allocation11 + $0xb8] sm:$0xff]  ;;  %1676 = vmatpush.bf16.msra.mxu2 %v2618_v19 }
 0x11a   : > { %1661 = vmatpush.bf16.msra.mxu1 %v2611_v40 }
 0x11b   : > { %1635 = vmatpush.bf16.msrb.mxu3 %v2593_v7 }
 0x11c   : > { %1649 = vmatpush.bf16.msra.mxu0 %v2601_v13 }
 0x11d   : > { %1677 = vmatpush.bf16.msra.mxu2 %v2617_v22 }
 0x11e   : > { %1662 = vmatpush.bf16.msra.mxu1 %v2610_v17 }
 0x11f   : > { %1636 = vmatpush.bf16.msrb.mxu3 %v2592_v8 }
 0x120   : > { %1650 = vmatpush.bf16.msra.mxu0 %v2600_v60 }
 0x121   : > { %1678 = vmatpush.bf16.msra.mxu2 %v2616_v27 }
 0x122   : > { %1663 = vmatpush.bf16.msra.mxu1 %v2609_v20 }
 0x123   : > { %1637 = vmatpush.bf16.msrb.mxu3 %v2591_v10  ;;  %v707_v10 = vperm.slane %v3208_v24, 2 }
 0x124   : > { %1651 = vmatpush.bf16.msra.mxu0 %v2599_v15 }
 0x125   : > { %1679 = vmatpush.bf16.msra.mxu2 %v2615_v34 }
 0x126   : > { %1664 = vmatpush.bf16.msra.mxu1 %v2608_v25 }
 0x127   : > { %1638 = vmatpush.bf16.msrb.mxu3 %v2590_v12  ;;  %v708_v12 = vperm.slane %v3208_v24, 3 }
 0x128   : > { %1652 = vmatpush.bf16.msra.mxu0 %v2598_v18 }
 0x129   : > { %1680 = vmatpush.bf16.msra.mxu2 %v2614_v38 }
 0x12a   : > { %1665 = vmatpush.bf16.msra.mxu1 %v2607_v31 }
 0x12b   : > { %1639 = vmatpush.bf16.msrb.mxu3 %v2589_v33 }
 0x12c   : > { %1653 = vmatpush.bf16.msra.mxu0 %v2597_v21 }
 0x12d   : > { %1681 = vmatpush.bf16.msra.mxu2 %v2613_v46 }
 0x12e   : > { %1666 = vmatpush.bf16.msra.mxu1 %v2606_v37  ;;  %v2726_v37 = vld [vmem:[%s3257_s6] ss:$0 sm:$0xff] }
 0x12f   : > { %1640 = vmatpush.bf16.msrb.mxu3 %v2588_v14 }
 0x130   : > { %1654 = vmatpush.bf16.msra.mxu0 %v2596_v26 }
 0x131   : > { %1682 = vmatpush.bf16.msra.mxu2 %v2612_v52 }
 0x132   : > { %1667 = vmatpush.bf16.msra.mxu1 %v2605_v43 }
 0x136   : > { %1668 = vmatpush.bf16.msra.mxu1 %v2604_v50 }
 0x16f   : > { %v1216_v23 = vpop.f32.mrf.mxu0 }
 0x174   : > { %v1202_v29 = vpop.f32.mrf.mxu3  ;;  %v1244_v30 = vpop.f32.mrf.mxu2 }
 0x175   : > { %v1203_v35 = vadd.f32 %v1202_v29, %v705_v28  ;;  %v1245_v61 = vadd.f32 %v1244_v30, %v706_v54 }
 0x176   : > { %v1230_v32 = vpop.f32.mrf.mxu1 }
 0x177   : > { %v1218_v36 = vpop.f32.mrf.mxu0  ;;  %v1217_v39 = vadd.f32 %v1216_v23, %v1203_v35 }
 0x179   : > { %v1231_v47 = vadd.f32 %v1230_v32, %v1217_v39 }
 0x17b   : > { %v1361_v53 = vmax.f32 %v1231_v47, 0.0 }
 0x17c   : > { %v1204_v41 = vpop.f32.mrf.mxu3  ;;  %v1246_v42 = vpop.f32.mrf.mxu2 }
 0x17d   : > { %v1205_v44 = vadd.f32 %v1204_v41, %v705_v28  ;;  %v1247_v0 = vadd.f32 %v1246_v42, %v706_v54 }
 0x17e   : > { %v1232_v45 = vpop.f32.mrf.mxu1 }
 0x17f   : > { %v1219_v48 = vadd.f32 %v1218_v36, %v1205_v44  ;;  %v1272_v49 = vpop.f32.mrf.mxu0 }
 0x181   : > { %v1233_v51 = vadd.f32 %v1232_v45, %v1219_v48 }
 0x183   : > { %v1365_v55 = vmax.f32 %v1233_v51, 0.0 }
 0x184   : > { %v1258_v56 = vpop.f32.mrf.mxu3  ;;  %v1300_v59 = vpop.f32.mrf.mxu2 }
 0x185   : > { %v1369_v57 = vpack.c.bf16 %v1365_v55, %v1361_v53  ;;  %v1259_v63 = vadd.f32 %v1258_v56, %v1245_v61 }
 0x186   : > { %v1286_v58 = vpop.f32.mrf.mxu1 }
 0x187   : > { %v1274_v62 = vpop.f32.mrf.mxu0  ;;  %1641 = vmatmul.bf16.vlgmr.msrb.gmra.mxu3 %v1369_v57  ;;  %v1273_v2 = vadd.f32 %v1272_v49, %v1259_v63  ;;  %v1287_v60 = vadd.f32 %v1286_v58, %v707_v10 }
 0x189   : > { %v1362_v8 = vmax.f32 %v1273_v2, 0.0  ;;  %v1301_v17 = vadd.f32 %v1300_v59, %v1287_v60 }
 0x18c   : > { %v1260_v1 = vpop.f32.mrf.mxu3  ;;  %v1302_v5 = vpop.f32.mrf.mxu2 }
 0x18d   : > { %v1261_v3 = vadd.f32 %v1260_v1, %v1247_v0 }
 0x18e   : > { %v1288_v4 = vpop.f32.mrf.mxu1 }
 0x18f   : > { %v1275_v6 = vadd.f32 %v1274_v62, %v1261_v3  ;;  %v1289_v40 = vadd.f32 %v1288_v4, %v707_v10 }
 0x190   : > { %v1328_v7 = vpop.f32.mrf.mxu0 }
 0x191   : > { %v1366_v9 = vmax.f32 %v1275_v6, 0.0  ;;  %v1329_v15 = vadd.f32 %v1328_v7, %v708_v12  ;;  %v1303_v19 = vadd.f32 %v1302_v5, %v1289_v40 }
 0x193   : > { %v1370_v11 = vpack.c.bf16 %v1366_v9, %v1362_v8 }
 0x195   : > { %v1314_v13 = vpop.f32.mrf.mxu3  ;;  %1655 = vmatmul.bf16.vlgmr.msra.gmra.mxu0 %v1370_v11 }
 0x196   : > { %v1342_v33 = vpop.f32.mrf.mxu1  ;;  %v1315_v20 = vadd.f32 %v1314_v13, %v1301_v17 }
 0x197   : > { %v1356_v14 = vpop.f32.mrf.mxu2  ;;  %v1343_v18 = vadd.f32 %v1342_v33, %v1329_v15 }
 0x198   : > { %v1330_v16 = vpop.f32.mrf.mxu0  ;;  %v1363_v24 = vmax.f32 %v1315_v20, 0.0 }
 0x199   : > { %v1331_v21 = vadd.f32 %v1330_v16, %v708_v12  ;;  %v1357_v25 = vadd.f32 %v1356_v14, %v1343_v18 }
 0x19b   : > { %v1364_v31 = vmax.f32 %v1357_v25, 0.0 }
 0x19d   : > { %v1316_v22 = vpop.f32.mrf.mxu3 }
 0x19e   : > { %v1344_v23 = vpop.f32.mrf.mxu1  ;;  %v1317_v26 = vadd.f32 %v1316_v22, %v1303_v19 }
 0x19f   : > { %v1345_v27 = vadd.f32 %v1344_v23, %v1331_v21  ;;  %v1358_v28 = vpop.f32.mrf.mxu2 }
 0x1a0   : > { %v1367_v29 = vmax.f32 %v1317_v26, 0.0 }
 0x1a1   : > { %v1359_v30 = vadd.f32 %v1358_v28, %v1345_v27 }
 0x1a2   : > { %v1371_v32 = vpack.c.bf16 %v1367_v29, %v1363_v24 }
 0x1a3   : > { %v1368_v34 = vmax.f32 %v1359_v30, 0.0 }
 0x1a4   : > { %1669 = vmatmul.bf16.vlgmr.msra.gmra.mxu1 %v1371_v32 }
 0x1a5   : > { %v1372_v35 = vpack.c.bf16 %v1368_v34, %v1364_v31 }
 0x1a7   : > { %1683 = vmatmul.bf16.vlgmr.msra.gmra.mxu2 %v1372_v35 }
 0x20a   : > { %v1642_v36 = vpop.f32.mrf.mxu3 }
 0x20b   : > { %v1643_v41 = vadd.f32 %v2726_v37, %v1642_v36 }
 0x212   : > { %v1656_v38 = vpop.f32.mrf.mxu0  ;;  %v1644_v44 = vpop.f32.mrf.mxu3 }
 0x213   : > { %v1657_v42 = vadd.f32 %v1656_v38, %v1643_v41  ;;  %v1645_v48 = vadd.f32 %v2726_v37, %v1644_v44 }
 0x21a   : > { %v1658_v47 = vpop.f32.mrf.mxu0 }
 0x21b   : > { %v1659_v50 = vadd.f32 %v1658_v47, %v1645_v48 }
 0x221   : > { %v1670_v39 = vpop.f32.mrf.mxu1 }
 0x222   : > { %v1671_v43 = vadd.f32 %v1670_v39, %v1657_v42 }
 0x229   : > { %v1672_v49 = vpop.f32.mrf.mxu1 }
 0x22a   : > { %v1684_v45 = vpop.f32.mrf.mxu2  ;;  %v1673_v51 = vadd.f32 %v1672_v49, %v1659_v50 }
 0x22b   : > { %v1685_v46 = vadd.f32 %v1684_v45, %v1671_v43 }
 0x22d   : > { %2727 = vtanh.f32 %v1685_v46 }
 0x232   : > { %v1686_v52 = vpop.f32.mrf.mxu2 }
 0x233   : > { %v2728_v53 = vpop.eup %2727  ;;  %v1687_v54 = vadd.f32 %v1686_v52, %v1673_v51 }
 0x234   : > { %1691 = vst [vmem:[%s377_s18] sm:$0xff] %v2728_v53 }
 0x235   : > { %2729 = vtanh.f32 %v1687_v54 }
 0x23b   : > { %v2730_v55 = vpop.eup %2729 }
 0x23c   : > { %1692 = vst [vmem:[%s377_s18 + $0x8] sm:$0xff] %v2730_v55 }
 0x23d   : > { %2938 = shalt.err (!%p2935_p9)
}
 0x23e   : > { %s3002_s16 = smov 128   ;;  %s3003_s20 = smov 8  }
 0x23f   : > { %2643 = dma.vmem_to_hbm [thread:$0]  (%p3133_p13), %s1707_s19, 256, %s1709_s30, %s1694_s29, %s3002_s16, %s3002_s16, %s3003_s20  }
 0x240 PF: > { %s1723_s10 = sand.u32 1, %s2977_s24   ;;  %p3271_p10 = scmp.ge.s32.totalorder %s2989_s27, 2 }
 0x241   : > { %s1724_s23 = scalar_lea.sflag [#allocation4], %s1723_s10 }
 0x242   : > { %p2666_p11 = pnand %p3271_p10, %p3138_p4 }
 0x244   : > { %p2667_p0 = pneg %p2666_p11 }
 0x246   : > { %2972 = dma.done.wait (%p2667_p0), %s1724_s23, 256  }
 0x247   : > { %2974 = vsyncadd (%p2667_p0), %s1724_s23, 4294967040  ;;  %p23_p2 = scmp.ge.s32.totalorder %s3113_s28, 4   ;;  %s3272_s24 = smov %s2981_s25 }
 0x248   : > { %s3273_s25 = smov %s2985_s26  ;;  %s3274_s26 = smov %s3125_s12 }
 0x249   : > { %s3275_s27 = smov %s3113_s28  ;;  %25 = sbr.rel (!%p23_p2) target bundleno = 10 (0xa), region = 113 }
 0x24e   :  { %1730 = vsyncpa [#allocation3], 1 }
 0x24f   :  { %1732 = vsyncpa [#allocation3 + $0x1], 1 }
 0x250   :  { %1733 = vsyncpa [#allocation6], 1 }
 0x251   :  { %1734 = vsyncpa [#allocation9], 1 }
 0x252   :  { %1735 = vsyncpa [#allocation12], 1 }
 0x253   :  { %1736 = vsyncpa [#allocation4], 1 }
 0x254   :  { %1738 = vsyncpa [#allocation4 + $0x1], 1 }

</bundles_post_ra>
